<compile_context>
chip_gen: v7x
topology: tpu7x:2x2x1
jax: 0.10.0
libtpu: 0.0.40
codegen_flags: <defaults>
</compile_context>

<pallas_src>
import functools

import jax
import jax.numpy as jnp
from jax.experimental import pallas as pl
from jax.experimental.pallas import tpu as pltpu

LANE = 128


def _round_up(x, m):
    return ((x + m - 1) // m) * m


# ----------------------------------------------------------------------------
# Shared per-step math (operates on VMEM refs / lane-padded tiles)
# ----------------------------------------------------------------------------
def _belief_step(latent, action, h, w_emb_ref, w_ih_ref, w_hh_ref,
                 b_emb, b_ih, b_hh):
    """One BeliefModel step on lane-padded (B, Hp) tiles.

    latent: (B, L)   action: (B, A)   h: (B, Hp)
    w_emb_ref: (L+A, Hp) ref; rows [0:L] multiply latent, rows [L:] action.
    w_ih_ref / w_hh_ref: (Hp, 3*Hp) refs, gate blocks [r | z | n] at lane
        offsets 0 / Hp / 2*Hp.
    b_emb: (B, Hp), b_ih / b_hh: (B, 3*Hp) -- pre-broadcast outside the loop.
    """
    L = latent.shape[1]
    Hp = h.shape[1]
    f32 = jnp.float32

    # Embedding: ReLU(latent @ We_l + action @ We_a + b_emb).  Two dots
    # accumulate into the same (B, Hp) tile (kept adjacent for MRB on v7x).
    emb = jnp.dot(latent, w_emb_ref[:L], preferred_element_type=f32)
    emb = emb + jnp.dot(action, w_emb_ref[L:], preferred_element_type=f32)
    emb = jnp.maximum(emb + b_emb, 0.0)

    # Fused GRU gate matmuls (2 MXU ops/step); lane-aligned result slices.
    gi = jnp.dot(emb, w_ih_ref[...], preferred_element_type=f32) + b_ih
    gh = jnp.dot(h, w_hh_ref[...], preferred_element_type=f32) + b_hh

    r = jax.nn.sigmoid(gi[:, 0 * Hp:1 * Hp] + gh[:, 0 * Hp:1 * Hp])   # EUP
    z = jax.nn.sigmoid(gi[:, 1 * Hp:2 * Hp] + gh[:, 1 * Hp:2 * Hp])   # EUP
    n = jnp.tanh(gi[:, 2 * Hp:3 * Hp] + r * gh[:, 2 * Hp:3 * Hp])     # EUP+VPU
    return (1.0 - z) * n + z * h                                       # VPU


# ----------------------------------------------------------------------------
# Single-step kernel (matches BeliefModel.forward)
# ----------------------------------------------------------------------------
def belief_step_kernel(latent_ref, action_ref, belief_ref,
                       w_emb_ref, w_ih_ref, w_hh_ref, b_ref, out_ref):
    B, Hp = out_ref.shape
    b_emb = jnp.broadcast_to(b_ref[0:1, :Hp], (B, Hp))
    b_ih = jnp.broadcast_to(b_ref[1:2, :], (B, 3 * Hp))
    b_hh = jnp.broadcast_to(b_ref[2:3, :], (B, 3 * Hp))
    h_new = _belief_step(latent_ref[...], action_ref[...], belief_ref[...],
                         w_emb_ref, w_ih_ref, w_hh_ref, b_emb, b_ih, b_hh)
    out_ref[...] = h_new.astype(out_ref.dtype)


@jax.jit
def belief_model_forward(latent, action, belief, params):
    """Single BeliefModel.forward step (the PyTorch module's semantics)."""
    B, H = belief.shape
    Hp = params["w_emb"].shape[1]
    belief_p = jnp.pad(belief, ((0, 0), (0, Hp - H)))
    vmem = pl.BlockSpec(memory_space=pltpu.MemorySpace.VMEM)
    out = pl.pallas_call(
        belief_step_kernel,
        out_shape=jax.ShapeDtypeStruct((B, Hp), jnp.float32),
        in_specs=[vmem] * 7,
        out_specs=vmem,
    )(latent, action, belief_p,
      params["w_emb"], params["w_ih"], params["w_hh"], params["b"])
    return out[:, :H]


# ----------------------------------------------------------------------------
# Fused rollout kernel: chunked time grid + in-kernel fori_loop over the chunk.
# Weights + hidden state stay resident in VMEM; per-step beliefs are staged
# into the (Tc, B, Hp) output block and written back once per chunk.
# ----------------------------------------------------------------------------
def belief_rollout_kernel(latents_ref, actions_ref, belief0_ref,
                          w_emb_ref, w_ih_ref, w_hh_ref, b_ref,
                          out_ref, h_scratch):
    Tc, B, _ = latents_ref.shape
    Hp = h_scratch.shape[1]

    @pl.when(pl.program_id(0) == 0)
    def _():
        h_scratch[...] = belief0_ref[...]

    # Hoist bias broadcasts out of the time loop.
    b_emb = jnp.broadcast_to(b_ref[0:1, :Hp], (B, Hp))
    b_ih = jnp.broadcast_to(b_ref[1:2, :], (B, 3 * Hp))
    b_hh = jnp.broadcast_to(b_ref[2:3, :], (B, 3 * Hp))

    def step(t, h):
        h_new = _belief_step(latents_ref[t], actions_ref[t], h,
                             w_emb_ref, w_ih_ref, w_hh_ref,
                             b_emb, b_ih, b_hh)
        out_ref[t] = h_new.astype(out_ref.dtype)
        return h_new

    h_final = jax.lax.fori_loop(0, Tc, step, h_scratch[...], unroll=Tc <= 16)
    h_scratch[...] = h_final


@functools.partial(jax.jit, static_argnames=("time_chunk",))
def belief_rollout(latents, actions, belief0, params, time_chunk=64):
    """Runs T recurrent BeliefModel steps; one pallas_call, chunked time grid."""
    T, B, L = latents.shape
    A = actions.shape[2]
    H = belief0.shape[1]
    Hp = params["w_emb"].shape[1]

    Tc = min(T, time_chunk)
    if T % Tc != 0:
        # TODO(synk): pad/mask ragged T; test sizes always divide evenly.
        raise ValueError(f"T={T} must be divisible by time_chunk={Tc}")

    belief0_p = jnp.pad(belief0, ((0, 0), (0, Hp - H)))

    out = pl.pallas_call(
        belief_rollout_kernel,
        out_shape=jax.ShapeDtypeStruct((T, B, Hp), jnp.float32),
        grid_spec=pltpu.PrefetchScalarGridSpec(
            num_scalar_prefetch=0,
            grid=(T // Tc,),
            in_specs=[
                pl.BlockSpec((Tc, B, L), lambda c: (c, 0, 0)),       # latents (streamed)
                pl.BlockSpec((Tc, B, A), lambda c: (c, 0, 0)),       # actions (streamed)
                pl.BlockSpec((B, Hp), lambda c: (0, 0)),             # belief0 (resident)
                pl.BlockSpec((L + A, Hp), lambda c: (0, 0)),         # w_emb   (resident)
                pl.BlockSpec((Hp, 3 * Hp), lambda c: (0, 0)),        # w_ih    (resident)
                pl.BlockSpec((Hp, 3 * Hp), lambda c: (0, 0)),        # w_hh    (resident)
                pl.BlockSpec((8, 3 * Hp), lambda c: (0, 0)),         # biases  (resident)
            ],
            out_specs=pl.BlockSpec((Tc, B, Hp), lambda c: (c, 0, 0)),
            scratch_shapes=[pltpu.VMEM((B, Hp), jnp.float32)],       # hidden state
        ),
        compiler_params=pltpu.CompilerParams(
            dimension_semantics=("arbitrary",)),                     # recurrence
    )(latents, actions, belief0_p,
      params["w_emb"], params["w_ih"], params["w_hh"], params["b"])
    return out[:, :, :H]


# ----------------------------------------------------------------------------
# Parameter init (dreamer_init: xavier / orthogonal / zero biases), packed
# into the lane-padded, fused-gate layout described in _belief_step.
# ----------------------------------------------------------------------------
def init_params(key, latent_state_size, action_size, belief_size):
    L, A, H = latent_state_size, action_size, belief_size
    Hp = _round_up(H, LANE)
    in_dim = L + A
    k1, k2, k3 = jax.random.split(key, 3)

    def xavier_uniform(k, fan_in, fan_out, shape):
        bound = jnp.sqrt(6.0 / (fan_in + fan_out))
        return jax.random.uniform(k, shape, jnp.float32, -bound, bound)

    # Linear(L+A -> H): torch weight (H, in_dim); stored transposed (in_dim, H),
    # zero-padded to (in_dim, Hp) so padded lanes stay exactly zero.
    w_emb_core = xavier_uniform(k1, in_dim, H, (in_dim, H))
    w_emb = jnp.zeros((in_dim, Hp), jnp.float32).at[:, :H].set(w_emb_core)

    # GRUCell weight_ih: torch (3H, H) xavier; weight_hh: torch (3H, H) orthogonal.
    # Transposed to (H, 3H), split into gates [r, z, n] and scattered into fused
    # (Hp, 3*Hp) slabs whose gate blocks start at lane offsets 0 / Hp / 2*Hp.
    w_ih_t = xavier_uniform(k2, H, 3 * H, (H, 3 * H))
    w_hh_t = jax.nn.initializers.orthogonal(scale=1.0)(k3, (3 * H, H), jnp.float32).T

    def pack_gates(w_t):  # (H, 3H) -> (Hp, 3*Hp), zero elsewhere
        slab = jnp.zeros((Hp, 3 * Hp), jnp.float32)
        for g in range(3):
            slab = slab.at[:H, g * Hp:g * Hp + H].set(w_t[:, g * H:(g + 1) * H])
        return slab

    w_ih = pack_gates(w_ih_t)
    w_hh = pack_gates(w_hh_t)

    # Bias slab (8, 3*Hp): row 0 = b_emb (first Hp lanes used), row 1 = b_ih
    # (r|z|n), row 2 = b_hh (r|z|n). All zero under dreamer_init.
    b = jnp.zeros((8, 3 * Hp), jnp.float32)

    return dict(w_emb=w_emb, w_ih=w_ih, w_hh=w_hh, b=b)


# ----------------------------------------------------------------------------
# Pure-JAX references (PyTorch GRUCell math, unpadded) for correctness checks
# ----------------------------------------------------------------------------
def reference_step(latent, action, belief, params):
    L = latent.shape[1]
    H = belief.shape[1]
    Hp = params["w_emb"].shape[1]
    w_emb = params["w_emb"][:, :H]
    b = params["b"]

    emb = jnp.maximum(latent @ w_emb[:L] + action @ w_emb[L:] + b[0, :H], 0.0)

    def gate(g):
        wi = params["w_ih"][:H, g * Hp:g * Hp + H]
        wh = params["w_hh"][:H, g * Hp:g * Hp + H]
        return emb @ wi + b[1, g * Hp:g * Hp + H], belief @ wh + b[2, g * Hp:g * Hp + H]

    gi_r, gh_r = gate(0)
    gi_z, gh_z = gate(1)
    gi_n, gh_n = gate(2)
    r = jax.nn.sigmoid(gi_r + gh_r)
    z = jax.nn.sigmoid(gi_z + gh_z)
    n = jnp.tanh(gi_n + r * gh_n)
    return (1.0 - z) * n + z * belief


def reference_rollout(latents, actions, belief0, params):
    def step(h, xs):
        lat, act = xs
        h_new = reference_step(lat, act, h, params)
        return h_new, h_new
    _, hs = jax.lax.scan(step, belief0, (latents, actions))
    return hs


# ----------------------------------------------------------------------------
if __name__ == "__main__":
    latent_state_size = 16
    action_size = 16
    belief_size = 32
    batch = 8
    T = 8

    key = jax.random.PRNGKey(0)
    kp, kl, ka, kb, ks = jax.random.split(key, 5)

    params = init_params(kp, latent_state_size, action_size, belief_size)
    latent = jax.random.normal(kl, (batch, latent_state_size), jnp.float32)
    action = jax.random.normal(ka, (batch, action_size), jnp.float32)
    belief = jax.random.normal(kb, (batch, belief_size), jnp.float32)

    # --- single step (BeliefModel.forward) ---
    out = jax.block_until_ready(belief_model_forward(latent, action, belief, params))
    ref = reference_step(latent, action, belief, params)
    assert out.shape == (batch, belief_size)
    assert jnp.allclose(out, ref, atol=1e-5, rtol=1e-5)

    # --- fused T-step rollout (one pallas_call, in-kernel time loop) ---
    kl2, ka2 = jax.random.split(ks)
    latents = jax.random.normal(kl2, (T, batch, latent_state_size), jnp.float32)
    actions = jax.random.normal(ka2, (T, batch, action_size), jnp.float32)
    beliefs = jax.block_until_ready(belief_rollout(latents, actions, belief, params))
    beliefs_ref = reference_rollout(latents, actions, belief, params)
    assert beliefs.shape == (T, batch, belief_size)
    assert jnp.allclose(beliefs, beliefs_ref, atol=1e-4, rtol=1e-4)

    print("KERNEL_OK")
</pallas_src>

<mosaic_0001>
module attributes {stable_mosaic.version = 11 : i64} {
  func.func @belief_step_kernel(%arg0: memref<8x16xf32, #tpu.memory_space<vmem>>, %arg1: memref<8x16xf32, #tpu.memory_space<vmem>>, %arg2: memref<8x128xf32, #tpu.memory_space<vmem>>, %arg3: memref<32x128xf32, #tpu.memory_space<vmem>>, %arg4: memref<128x384xf32, #tpu.memory_space<vmem>>, %arg5: memref<128x384xf32, #tpu.memory_space<vmem>>, %arg6: memref<8x384xf32, #tpu.memory_space<vmem>>, %arg7: memref<8x128xf32, #tpu.memory_space<vmem>>) attributes {dimension_semantics = [], scalar_prefetch = 0 : i64, scratch_operands = 0 : i64, tpu.core_type = #tpu.core_type<tc>} {
    %c0 = arith.constant 0 : index
    %c0_0 = arith.constant 0 : index
    %0 = vector.load %arg6[%c0, %c0_0] : memref<8x384xf32, #tpu.memory_space<vmem>>, vector<1x128xf32>
    %1 = vector.shape_cast %0 : vector<1x128xf32> to vector<1x128xf32>
    %2 = vector.broadcast %1 : vector<1x128xf32> to vector<8x128xf32>
    %c1 = arith.constant 1 : index
    %c0_1 = arith.constant 0 : index
    %3 = vector.load %arg6[%c1, %c0_1] : memref<8x384xf32, #tpu.memory_space<vmem>>, vector<1x384xf32>
    %4 = vector.shape_cast %3 : vector<1x384xf32> to vector<1x384xf32>
    %5 = vector.broadcast %4 : vector<1x384xf32> to vector<8x384xf32>
    %c2 = arith.constant 2 : index
    %c0_2 = arith.constant 0 : index
    %6 = vector.load %arg6[%c2, %c0_2] : memref<8x384xf32, #tpu.memory_space<vmem>>, vector<1x384xf32>
    %7 = vector.shape_cast %6 : vector<1x384xf32> to vector<1x384xf32>
    %8 = vector.broadcast %7 : vector<1x384xf32> to vector<8x384xf32>
    %c0_3 = arith.constant 0 : index
    %c0_4 = arith.constant 0 : index
    %9 = vector.load %arg0[%c0_3, %c0_4] : memref<8x16xf32, #tpu.memory_space<vmem>>, vector<8x16xf32>
    %c0_5 = arith.constant 0 : index
    %c0_6 = arith.constant 0 : index
    %10 = vector.load %arg1[%c0_5, %c0_6] : memref<8x16xf32, #tpu.memory_space<vmem>>, vector<8x16xf32>
    %c0_7 = arith.constant 0 : index
    %c0_8 = arith.constant 0 : index
    %11 = vector.load %arg2[%c0_7, %c0_8] : memref<8x128xf32, #tpu.memory_space<vmem>>, vector<8x128xf32>
    %c0_9 = arith.constant 0 : index
    %c0_10 = arith.constant 0 : index
    %12 = vector.load %arg3[%c0_9, %c0_10] : memref<32x128xf32, #tpu.memory_space<vmem>>, vector<16x128xf32>
    %cst = arith.constant dense<0.000000e+00> : vector<8x128xf32>
    %13 = tpu.matmul %9, %12, %cst {dimension_numbers = #tpu.dot_dimension_numbers<[1], [0], [0], [1], [0, 0, 1, 1], [], []>} : vector<8x16xf32>, vector<16x128xf32>, vector<8x128xf32> -> vector<8x128xf32>
    %c16 = arith.constant 16 : index
    %c0_11 = arith.constant 0 : index
    %14 = vector.load %arg3[%c16, %c0_11] : memref<32x128xf32, #tpu.memory_space<vmem>>, vector<16x128xf32>
    %cst_12 = arith.constant dense<0.000000e+00> : vector<8x128xf32>
    %15 = tpu.matmul %10, %14, %cst_12 {dimension_numbers = #tpu.dot_dimension_numbers<[1], [0], [0], [1], [0, 0, 1, 1], [], []>} : vector<8x16xf32>, vector<16x128xf32>, vector<8x128xf32> -> vector<8x128xf32>
    %16 = arith.addf %13, %15 : vector<8x128xf32>
    %17 = arith.addf %16, %2 : vector<8x128xf32>
    %cst_13 = arith.constant 0.000000e+00 : f32
    %18 = vector.broadcast %cst_13 : f32 to vector<8x128xf32>
    %19 = arith.maximumf %17, %18 : vector<8x128xf32>
    %c0_14 = arith.constant 0 : index
    %c0_15 = arith.constant 0 : index
    %20 = vector.load %arg4[%c0_14, %c0_15] : memref<128x384xf32, #tpu.memory_space<vmem>>, vector<128x384xf32>
    %cst_16 = arith.constant dense<0.000000e+00> : vector<8x384xf32>
    %21 = tpu.matmul %19, %20, %cst_16 {dimension_numbers = #tpu.dot_dimension_numbers<[1], [0], [0], [1], [0, 0, 1, 1], [], []>} : vector<8x128xf32>, vector<128x384xf32>, vector<8x384xf32> -> vector<8x384xf32>
    %22 = arith.addf %21, %5 : vector<8x384xf32>
    %c0_17 = arith.constant 0 : index
    %c0_18 = arith.constant 0 : index
    %23 = vector.load %arg5[%c0_17, %c0_18] : memref<128x384xf32, #tpu.memory_space<vmem>>, vector<128x384xf32>
    %cst_19 = arith.constant dense<0.000000e+00> : vector<8x384xf32>
    %24 = tpu.matmul %11, %23, %cst_19 {dimension_numbers = #tpu.dot_dimension_numbers<[1], [0], [0], [1], [0, 0, 1, 1], [], []>} : vector<8x128xf32>, vector<128x384xf32>, vector<8x384xf32> -> vector<8x384xf32>
    %25 = arith.addf %24, %8 : vector<8x384xf32>
    %26 = vector.extract_strided_slice %22 {offsets = [0, 0], sizes = [8, 128], strides = [1, 1]} : vector<8x384xf32> to vector<8x128xf32>
    %27 = vector.extract_strided_slice %25 {offsets = [0, 0], sizes = [8, 128], strides = [1, 1]} : vector<8x384xf32> to vector<8x128xf32>
    %28 = arith.addf %26, %27 : vector<8x128xf32>
    %29 = arith.negf %28 : vector<8x128xf32>
    %30 = math.exp %29 : vector<8x128xf32>
    %cst_20 = arith.constant 1.000000e+00 : f32
    %31 = vector.broadcast %cst_20 : f32 to vector<8x128xf32>
    %32 = arith.addf %31, %30 : vector<8x128xf32>
    %33 = arith.divf %31, %32 : vector<8x128xf32>
    %34 = vector.extract_strided_slice %22 {offsets = [0, 128], sizes = [8, 128], strides = [1, 1]} : vector<8x384xf32> to vector<8x128xf32>
    %35 = vector.extract_strided_slice %25 {offsets = [0, 128], sizes = [8, 128], strides = [1, 1]} : vector<8x384xf32> to vector<8x128xf32>
    %36 = arith.addf %34, %35 : vector<8x128xf32>
    %37 = arith.negf %36 : vector<8x128xf32>
    %38 = math.exp %37 : vector<8x128xf32>
    %cst_21 = arith.constant 1.000000e+00 : f32
    %39 = vector.broadcast %cst_21 : f32 to vector<8x128xf32>
    %40 = arith.addf %39, %38 : vector<8x128xf32>
    %41 = arith.divf %39, %40 : vector<8x128xf32>
    %42 = vector.extract_strided_slice %22 {offsets = [0, 256], sizes = [8, 128], strides = [1, 1]} : vector<8x384xf32> to vector<8x128xf32>
    %43 = vector.extract_strided_slice %25 {offsets = [0, 256], sizes = [8, 128], strides = [1, 1]} : vector<8x384xf32> to vector<8x128xf32>
    %44 = arith.mulf %33, %43 : vector<8x128xf32>
    %45 = arith.addf %42, %44 : vector<8x128xf32>
    %46 = math.tanh %45 : vector<8x128xf32>
    %cst_22 = arith.constant 1.000000e+00 : f32
    %47 = vector.broadcast %cst_22 : f32 to vector<8x128xf32>
    %48 = arith.subf %47, %41 : vector<8x128xf32>
    %49 = arith.mulf %48, %46 : vector<8x128xf32>
    %50 = arith.mulf %41, %11 : vector<8x128xf32>
    %51 = arith.addf %49, %50 : vector<8x128xf32>
    %c0_23 = arith.constant 0 : index
    %c0_24 = arith.constant 0 : index
    %52 = vector.load %arg7[%c0_23, %c0_24] : memref<8x128xf32, #tpu.memory_space<vmem>>, vector<8x128xf32>
    tpu.vector_store %arg7[%c0_23, %c0_24], %51 {strides = array<i32>} : memref<8x128xf32, #tpu.memory_space<vmem>>, vector<8x128xf32>,
    return
  }
}

</mosaic_0001>

<bundles_post_ra>
// kernel: belief_model_forward.1
= control target key start
LH: loop header
LB: loop body
LE: loop exit
PB: predicated region body
PF: predicated region fallthrough
CT: control target
= control target key end

     0   :  { %12 = vsyncpa [#allocation3], 0  ;;  %s1286_s0 = inlined_call_operand.hbm [shape: f32[8,16], index: 0, kind: input, shape index: {}]   ;;  %s1287_s1 = inlined_call_operand.hbm [shape: f32[8,16], index: 1, kind: input, shape index: {}]   ;;  %s1288_s2 = inlined_call_operand.vmem [shape: f32[8,128], index: 2, kind: input, shape index: {}]   ;;  %s1289_s3 = inlined_call_operand.vmem [shape: f32[32,128], index: 3, kind: input, shape index: {}]   ;;  %s1290_s4 = inlined_call_operand.hbm [shape: f32[128,384], index: 4, kind: input, shape index: {}]   ;;  %s1291_s5 = inlined_call_operand.hbm [shape: f32[128,384], index: 5, kind: input, shape index: {}]   ;;  %s1292_s6 = inlined_call_operand.hbm [shape: f32[8,384], index: 6, kind: input, shape index: {}]   ;;  %s1293_s7 = inlined_call_operand.hbm [shape: f32[8,128], index: 7, kind: output, shape index: {}]  }
   0x1   :  { %13 = vsyncpa [#allocation6], 0 }
   0x2   :  { %14 = vsyncpa [#allocation9], 0 }
   0x3   :  { %15 = vsyncpa [#allocation4], 0  ;;  %s1112_s24 = smov [#allocation5]   ;;  %s972_s28 = scalar_lea.hbm %s1287_s1, 128 }
   0x4   :  { %s32_s25 = sshll.u32 %s1112_s24, 4  ;;  %p973_p0 = scmp.ne.s32.totalorder %s1287_s1, %s972_s28  ;;  %s33_s25 = int_to_ptr.vmem [resolvable:$true] %s32_s25 }
   0x5   :  { %p976_p1 = scmp.lt.u32.totalorder %s972_s28, %s1287_s1 }
   0x7   :  { %p978_p2 = pnand %p976_p1, %p973_p0 }
   0x9   :  { %981 = shalt.err (!%p978_p2)
}
   0xa   :  { %s982_s10 = scalar_lea.vmem %s33_s25, 128  ;;  %p987_p4 = scmp.lt.s32.totalorder %s33_s25, %s33_s25 }
   0xb   :  { %p983_p3 = scmp.ne.s32.totalorder %s33_s25, %s982_s10  ;;  %p988_p5 = scmp.lt.s32.totalorder %s982_s10, %s982_s10 }
   0xd   :  { %p989_p6 = por %p988_p5, %p987_p4 }
   0xf   :  { %p990_p7 = pnand %p989_p6, %p983_p3 }
  0x11   :  { %993 = shalt.err (!%p990_p7)
}
  0x12   :  { %35 = dma.hbm_to_vmem [thread:$0]  %s1287_s1, 128, %s33_s25, [#allocation6]  }
  0x13   :  { %s1113_s13 = smov [#allocation8]   ;;  %s1114_s15 = smov [#allocation2]  }
  0x14   :  { %s57_s14 = sshll.u32 %s1113_s13, 4  ;;  %s22_s16 = sshll.u32 %s1114_s15, 4  ;;  %s58_s14 = int_to_ptr.vmem [resolvable:$true] %s57_s14  ;;  %s23_s16 = int_to_ptr.vmem [resolvable:$true] %s22_s16 }
  0x15   :  { %s994_s19 = scalar_lea.hbm %s1291_s5, 6144 }
  0x16   :  { %p995_p8 = scmp.ne.s32.totalorder %s1291_s5, %s994_s19  ;;  %p998_p9 = scmp.lt.u32.totalorder %s994_s19, %s1291_s5 }
  0x18   :  { %p1000_p10 = pnand %p998_p9, %p995_p8 }
  0x1a   :  { %1003 = shalt.err (!%p1000_p10)
}
  0x1b   :  { %s1004_s1 = scalar_lea.vmem %s58_s14, 6144  ;;  %p1009_p12 = scmp.lt.s32.totalorder %s58_s14, %s58_s14 }
  0x1c   :  { %p1005_p11 = scmp.ne.s32.totalorder %s58_s14, %s1004_s1  ;;  %p1010_p13 = scmp.lt.s32.totalorder %s1004_s1, %s1004_s1 }
  0x1e   :  { %p1011_p0 = por %p1010_p13, %p1009_p12 }
  0x20   :  { %p1012_p1 = pnand %p1011_p0, %p1005_p11 }
  0x22   :  { %1015 = shalt.err (!%p1012_p1)
}
  0x23   :  { %s1115_s24 = smov 384   ;;  %s1116_s25 = smov 24  }
  0x24   :  { %63 = dma.hbm_to_vmem [thread:$0]  %s1291_s5, 6144, %s58_s14, [#allocation9], %s1115_s24, %s1115_s24, %s1116_s25  }
  0x25   :  { %s1016_s30 = scalar_lea.hbm %s1286_s0, 128 }
  0x26   :  { %p1017_p2 = scmp.ne.s32.totalorder %s1286_s0, %s1016_s30  ;;  %p1020_p3 = scmp.lt.u32.totalorder %s1016_s30, %s1286_s0 }
  0x28   :  { %p1022_p4 = pnand %p1020_p3, %p1017_p2 }
  0x2a   :  { %1025 = shalt.err (!%p1022_p4)
}
  0x2b   :  { %s1026_s12 = scalar_lea.vmem %s23_s16, 128  ;;  %p1031_p6 = scmp.lt.s32.totalorder %s23_s16, %s23_s16 }
  0x2c   :  { %p1027_p5 = scmp.ne.s32.totalorder %s23_s16, %s1026_s12  ;;  %p1032_p7 = scmp.lt.s32.totalorder %s1026_s12, %s1026_s12 }
  0x2e   :  { %p1033_p8 = por %p1032_p7, %p1031_p6 }
  0x30   :  { %p1034_p9 = pnand %p1033_p8, %p1027_p5 }
  0x32   :  { %1037 = shalt.err (!%p1034_p9)
}
  0x33   :  { %25 = dma.hbm_to_vmem [thread:$0]  %s1286_s0, 128, %s23_s16, [#allocation3]  }
  0x34   :  { %s1117_s14 = smov [#allocation7]   ;;  %s1118_s17 = smov [#allocation10]  }
  0x35   :  { %s45_s15 = sshll.u32 %s1117_s14, 4  ;;  %s70_s18 = sshll.u32 %s1118_s17, 4  ;;  %s46_s15 = int_to_ptr.vmem [resolvable:$true] %s45_s15  ;;  %s71_s18 = int_to_ptr.vmem [resolvable:$true] %s70_s18 }
  0x36   :  { %s1038_s21 = scalar_lea.hbm %s1290_s4, 6144 }
  0x37   :  { %p1039_p10 = scmp.ne.s32.totalorder %s1290_s4, %s1038_s21  ;;  %p1042_p11 = scmp.lt.u32.totalorder %s1038_s21, %s1290_s4 }
  0x39   :  { %p1044_p12 = pnand %p1042_p11, %p1039_p10 }
  0x3b   :  { %1047 = shalt.err (!%p1044_p12)
}
  0x3c   :  { %s1048_s0 = scalar_lea.vmem %s46_s15, 6144  ;;  %p1053_p0 = scmp.lt.s32.totalorder %s46_s15, %s46_s15 }
  0x3d   :  { %p1049_p13 = scmp.ne.s32.totalorder %s46_s15, %s1048_s0  ;;  %p1054_p1 = scmp.lt.s32.totalorder %s1048_s0, %s1048_s0 }
  0x3f   :  { %p1055_p2 = por %p1054_p1, %p1053_p0 }
  0x41   :  { %p1056_p3 = pnand %p1055_p2, %p1049_p13 }
  0x43   :  { %1059 = shalt.err (!%p1056_p3)
}
  0x44   :  { %51 = dma.hbm_to_vmem [thread:$0]  %s1290_s4, 6144, %s46_s15, [#allocation6], %s1115_s24, %s1115_s24, %s1116_s25  }
  0x45   :  { %s1060_s30 = scalar_lea.hbm %s1292_s6, 384 }
  0x46   :  { %p1061_p4 = scmp.ne.s32.totalorder %s1292_s6, %s1060_s30  ;;  %p1064_p5 = scmp.lt.u32.totalorder %s1060_s30, %s1292_s6 }
  0x48   :  { %p1066_p6 = pnand %p1064_p5, %p1061_p4 }
  0x4a   :  { %1069 = shalt.err (!%p1066_p6)
}
  0x4b   :  { %s1070_s12 = scalar_lea.vmem %s71_s18, 384  ;;  %p1075_p8 = scmp.lt.s32.totalorder %s71_s18, %s71_s18 }
  0x4c   :  { %p1071_p7 = scmp.ne.s32.totalorder %s71_s18, %s1070_s12  ;;  %p1076_p9 = scmp.lt.s32.totalorder %s1070_s12, %s1070_s12 }
  0x4e   :  { %p1077_p10 = por %p1076_p9, %p1075_p8 }
  0x50   :  { %p1078_p11 = pnand %p1077_p10, %p1071_p7 }
  0x52   :  { %1081 = shalt.err (!%p1078_p11)
}
  0x53   :  { %73 = dma.hbm_to_vmem [thread:$0]  %s1292_s6, 384, %s71_s18, [#allocation9]  }
  0x54   :  { %1104 = dma.done.wait [#allocation3], 128  }
  0x55   :  { %1105 = vsyncadd [#allocation3], 4294967168 }
  0x56   :  { %1106 = dma.done.wait [#allocation6], 6272  }
  0x57   :  { %1107 = vsyncadd [#allocation6], 4294961024 }
  0x58   :  { %1108 = dma.done.wait [#allocation9], 6528  }
  0x59   :  { %1109 = vsyncadd [#allocation9], 4294960768  ;;  %v1119_v0 = vmov 0.0|0.0   ;;  %vm1120_vm0 = vmmov 0   ;;  %v1121_v1 = vmov 0.0   ;;  %v131_v2 = vld [vmem:[%s1289_s3 + $0x10] sm:$0xff] }
  0x5a   :  { %827 = vmatprep.subr.bf16.mxu0 %v1119_v0  ;;  %830 = vmatprep.subr.bf16.mxu1 %v1119_v0  ;;  %v132_v3 = vld [vmem:[%s1289_s3 + $0x18] sm:$0xff]  ;;  %v129_v4 = vld [vmem:[%s1289_s3] sm:$0xff]  ;;  %v130_v6 = vld [vmem:[%s1289_s3 + $0x8] sm:$0xff]  ;;  %vm133_vm1 = vcmask 130048  }
  0x5b   :  { %747 = vmatprep.mubr.msk.f32.mxu0 %vm1120_vm0, %v1121_v1  ;;  %754 = vmatprep.mubr.msk.f32.mxu1 %vm1120_vm0, %v1121_v1  ;;  %v828_v5 = vpack.c.bf16 %v132_v3, %v131_v2  ;;  %v127_v7 = vld [vmem:[#allocation5] sm:$0xff]  ;;  %v831_v8 = vpack.c.bf16 %v130_v6, %v129_v4  ;;  %v126_v9 = vld [vmem:[#allocation2] sm:$0xff]  ;;  %v283_v10 = vld [vmem:[#allocation7 + $0x8] sm:$0xff] }
  0x5c   :  { %v286_v11 = vld [vmem:[#allocation7 + $0x20] sm:$0xff]  ;;  %v285_v14 = vld [vmem:[#allocation7 + $0x18] sm:$0xff]  ;;  %v284_v15 = vld [vmem:[#allocation7 + $0x10] sm:$0xff] }
  0x5d   :  { %v282_v12 = vld [vmem:[#allocation7] sm:$0xff]  ;;  %829 = vmatpush3.bf16.msra.mxu0 %v828_v5  ;;  %v833_v13 = vpack.c.bf16 %v286_v11, %v283_v10  ;;  %v287_v16 = vld [vmem:[#allocation7 + $0x28] sm:$0xff]  ;;  %832 = vmatpush3.bf16.msra.mxu1 %v831_v8  ;;  %v289_v19 = vld [vmem:[#allocation7 + $0x38] sm:$0xff] }
  0x5e   :  { %v835_v17 = vpack.c.bf16 %v285_v14, %v282_v12  ;;  %v866_v18 = vpack.c.bf16 %v287_v16, %v284_v15  ;;  %v292_v20 = vld [vmem:[#allocation7 + $0x50] sm:$0xff]  ;;  %865 = vmatprep.subr.bf16.mxu1 %v1119_v0  ;;  %v291_v23 = vld [vmem:[#allocation7 + $0x48] sm:$0xff]  ;;  %v290_v24 = vld [vmem:[#allocation7 + $0x40] sm:$0xff] }
  0x5f   :  { %v288_v21 = vld [vmem:[#allocation7 + $0x30] sm:$0xff]  ;;  %834 = vmatprep.subr.bf16.mxu0 %v833_v13  ;;  %v837_v22 = vpack.c.bf16 %v292_v20, %v289_v19  ;;  %v293_v25 = vld [vmem:[#allocation7 + $0x58] sm:$0xff]  ;;  %v295_v26 = vld [vmem:[#allocation7 + $0x68] sm:$0xff] }
  0x60   :  { %748 = vmatmul.mubr.msk.f32.vlgmr.msra.gmra.mrb[0].mxu0 %vm133_vm1, %v127_v7  ;;  %v298_v27 = vld [vmem:[#allocation7 + $0x80] sm:$0xff]  ;;  %755 = vmatmul.mubr.msk.f32.vlgmr.msra.gmra.mrb[0].mxu1 %vm133_vm1, %v126_v9  ;;  %v839_v28 = vpack.c.bf16 %v291_v23, %v288_v21  ;;  %v869_v29 = vpack.c.bf16 %v293_v25, %v290_v24  ;;  %v297_v32 = vld [vmem:[#allocation7 + $0x78] sm:$0xff]  ;;  %v296_v33 = vld [vmem:[#allocation7 + $0x70] sm:$0xff] }
  0x61   :  { %836 = vmatpush1.bf16.msra.mxu0 %v835_v17  ;;  %867 = vmatpush3.bf16.msra.mxu1 %v866_v18  ;;  %v841_v30 = vpack.c.bf16 %v298_v27, %v295_v26  ;;  %v294_v31 = vld [vmem:[#allocation7 + $0x60] sm:$0xff]  ;;  %v299_v34 = vld [vmem:[#allocation7 + $0x88] sm:$0xff]  ;;  %v301_v35 = vld [vmem:[#allocation7 + $0x98] sm:$0xff] }
  0x62   :  { %838 = vmatprep.subr.bf16.mxu0 %v837_v22  ;;  %868 = vmatprep.subr.bf16.mxu1 %v1119_v0  ;;  %v304_v36 = vld [vmem:[#allocation7 + $0xb0] sm:$0xff]  ;;  %v843_v37 = vpack.c.bf16 %v297_v32, %v294_v31  ;;  %v872_v38 = vpack.c.bf16 %v299_v34, %v296_v33  ;;  %v303_v41 = vld [vmem:[#allocation7 + $0xa8] sm:$0xff]  ;;  %v302_v42 = vld [vmem:[#allocation7 + $0xa0] sm:$0xff] }
  0x63   :  { %394 = vmatprep.mubr.f32.mxu0 %v1121_v1  ;;  %789 = vmatprep.mubr.msk.f32.mxu1 %vm1120_vm0, %v1121_v1  ;;  %v845_v39 = vpack.c.bf16 %v304_v36, %v301_v35  ;;  %v300_v40 = vld [vmem:[#allocation7 + $0x90] sm:$0xff]  ;;  %v305_v43 = vld [vmem:[#allocation7 + $0xb8] sm:$0xff]  ;;  %v307_v44 = vld [vmem:[#allocation7 + $0xc8] sm:$0xff] }
  0x64   :  { %v310_v45 = vld [vmem:[#allocation7 + $0xe0] sm:$0xff]  ;;  %v847_v46 = vpack.c.bf16 %v303_v41, %v300_v40  ;;  %v875_v47 = vpack.c.bf16 %v305_v43, %v302_v42  ;;  %v309_v50 = vld [vmem:[#allocation7 + $0xd8] sm:$0xff]  ;;  %v308_v51 = vld [vmem:[#allocation7 + $0xd0] sm:$0xff] }
  0x65   :  { %840 = vmatpush1.bf16.msra.mxu0 %v839_v28  ;;  %870 = vmatpush3.bf16.msra.mxu1 %v869_v29  ;;  %v849_v48 = vpack.c.bf16 %v310_v45, %v307_v44  ;;  %v306_v49 = vld [vmem:[#allocation7 + $0xc0] sm:$0xff]  ;;  %v311_v52 = vld [vmem:[#allocation7 + $0xe8] sm:$0xff]  ;;  %v313_v53 = vld [vmem:[#allocation7 + $0xf8] sm:$0xff] }
  0x66   :  { %842 = vmatprep.subr.bf16.mxu0 %v841_v30  ;;  %871 = vmatprep.subr.bf16.mxu1 %v1119_v0  ;;  %v316_v54 = vld [vmem:[#allocation7 + $0x110] sm:$0xff]  ;;  %v851_v55 = vpack.c.bf16 %v309_v50, %v306_v49  ;;  %v878_v56 = vpack.c.bf16 %v311_v52, %v308_v51  ;;  %v315_v59 = vld [vmem:[#allocation7 + $0x108] sm:$0xff]  ;;  %v314_v60 = vld [vmem:[#allocation7 + $0x100] sm:$0xff] }
  0x67   :  { %v853_v57 = vpack.c.bf16 %v316_v54, %v313_v53  ;;  %v312_v58 = vld [vmem:[#allocation7 + $0xf0] sm:$0xff]  ;;  %v317_v61 = vld [vmem:[#allocation7 + $0x118] sm:$0xff]  ;;  %v319_v62 = vld [vmem:[#allocation7 + $0x128] sm:$0xff] }
  0x68   :  { %v322_v63 = vld [vmem:[#allocation7 + $0x140] sm:$0xff]  ;;  %v855_v2 = vpack.c.bf16 %v315_v59, %v312_v58  ;;  %v881_v3 = vpack.c.bf16 %v317_v61, %v314_v60  ;;  %v321_v6 = vld [vmem:[#allocation7 + $0x138] sm:$0xff]  ;;  %v320_v8 = vld [vmem:[#allocation7 + $0x130] sm:$0xff] }
  0x69   :  { %844 = vmatpush1.bf16.msra.mxu0 %v843_v37  ;;  %873 = vmatpush3.bf16.msra.mxu1 %v872_v38  ;;  %v857_v4 = vpack.c.bf16 %v322_v63, %v319_v62  ;;  %v318_v5 = vld [vmem:[#allocation7 + $0x120] sm:$0xff]  ;;  %v323_v9 = vld [vmem:[#allocation7 + $0x148] sm:$0xff]  ;;  %v325_v11 = vld [vmem:[#allocation7 + $0x158] sm:$0xff] }
  0x6a   :  { %846 = vmatprep.subr.bf16.mxu0 %v845_v39  ;;  %874 = vmatprep.subr.bf16.mxu1 %v1119_v0  ;;  %v859_v7 = vpack.c.bf16 %v321_v6, %v318_v5  ;;  %v884_v10 = vpack.c.bf16 %v323_v9, %v320_v8  ;;  %v328_v12 = vld [vmem:[#allocation7 + $0x170] sm:$0xff]  ;;  %v327_v15 = vld [vmem:[#allocation7 + $0x168] sm:$0xff]  ;;  %v326_v17 = vld [vmem:[#allocation7 + $0x160] sm:$0xff] }
  0x6b   :  { %v861_v13 = vpack.c.bf16 %v328_v12, %v325_v11  ;;  %v324_v14 = vld [vmem:[#allocation7 + $0x150] sm:$0xff]  ;;  %v329_v18 = vld [vmem:[#allocation7 + $0x178] sm:$0xff]  ;;  %v472_v20 = vld [vmem:[#allocation8 + $0x8] sm:$0xff] }
  0x6c   :  { %v863_v16 = vpack.c.bf16 %v327_v15, %v324_v14  ;;  %v887_v19 = vpack.c.bf16 %v329_v18, %v326_v17  ;;  %v475_v21 = vld [vmem:[#allocation8 + $0x20] sm:$0xff]  ;;  %v474_v30 = vld [vmem:[#allocation8 + $0x18] sm:$0xff]  ;;  %v473_v31 = vld [vmem:[#allocation8 + $0x10] sm:$0xff] }
  0x6d   :  { %848 = vmatpush1.bf16.msra.mxu0 %v847_v46  ;;  %876 = vmatpush3.bf16.msra.mxu1 %v875_v47  ;;  %v889_v22 = vpack.c.bf16 %v475_v21, %v472_v20  ;;  %v89_v24 = vld [vmem:[#allocation10] ss:$0 sm:$0xff]  ;;  %v476_v32 = vld [vmem:[#allocation8 + $0x28] sm:$0xff]  ;;  %v478_v33 = vld [vmem:[#allocation8 + $0x38] sm:$0xff] }
  0x6e   :  { %850 = vmatprep.subr.bf16.mxu0 %v849_v48  ;;  %877 = vmatprep.subr.bf16.mxu1 %v1119_v0  ;;  %v471_v27 = vld [vmem:[#allocation8] sm:$0xff]  ;;  %v481_v34 = vld [vmem:[#allocation8 + $0x50] sm:$0xff]  ;;  %v922_v38 = vpack.c.bf16 %v476_v32, %v473_v31  ;;  %v480_v41 = vld [vmem:[#allocation8 + $0x48] sm:$0xff] }
  0x6f   :  { %v891_v36 = vpack.c.bf16 %v474_v30, %v471_v27  ;;  %v477_v37 = vld [vmem:[#allocation8 + $0x30] sm:$0xff]  ;;  %v893_v40 = vpack.c.bf16 %v481_v34, %v478_v33  ;;  %v479_v42 = vld [vmem:[#allocation8 + $0x40] sm:$0xff]  ;;  %v482_v43 = vld [vmem:[#allocation8 + $0x58] sm:$0xff] }
  0x70   :  { %v484_v44 = vld [vmem:[#allocation8 + $0x68] sm:$0xff]  ;;  %v487_v45 = vld [vmem:[#allocation8 + $0x80] sm:$0xff]  ;;  %v895_v46 = vpack.c.bf16 %v480_v41, %v477_v37  ;;  %v925_v48 = vpack.c.bf16 %v482_v43, %v479_v42  ;;  %v486_v50 = vld [vmem:[#allocation8 + $0x78] sm:$0xff] }
  0x71   :  { %852 = vmatpush1.bf16.msra.mxu0 %v851_v55  ;;  %879 = vmatpush3.bf16.msra.mxu1 %v878_v56  ;;  %v483_v47 = vld [vmem:[#allocation8 + $0x60] sm:$0xff]  ;;  %v897_v49 = vpack.c.bf16 %v487_v45, %v484_v44  ;;  %v485_v51 = vld [vmem:[#allocation8 + $0x70] sm:$0xff]  ;;  %v488_v52 = vld [vmem:[#allocation8 + $0x88] sm:$0xff] }
  0x72   :  { %854 = vmatprep.subr.bf16.mxu0 %v853_v57  ;;  %880 = vmatprep.subr.bf16.mxu1 %v1119_v0  ;;  %v490_v53 = vld [vmem:[#allocation8 + $0x98] sm:$0xff]  ;;  %v493_v54 = vld [vmem:[#allocation8 + $0xb0] sm:$0xff]  ;;  %v899_v55 = vpack.c.bf16 %v486_v50, %v483_v47  ;;  %v928_v57 = vpack.c.bf16 %v488_v52, %v485_v51  ;;  %v492_v59 = vld [vmem:[#allocation8 + $0xa8] sm:$0xff] }
  0x73   :  { %v489_v56 = vld [vmem:[#allocation8 + $0x90] sm:$0xff]  ;;  %v901_v58 = vpack.c.bf16 %v493_v54, %v490_v53  ;;  %v491_v60 = vld [vmem:[#allocation8 + $0xa0] sm:$0xff]  ;;  %v494_v61 = vld [vmem:[#allocation8 + $0xb8] sm:$0xff] }
  0x74   :  { %v496_v62 = vld [vmem:[#allocation8 + $0xc8] sm:$0xff]  ;;  %v499_v63 = vld [vmem:[#allocation8 + $0xe0] sm:$0xff]  ;;  %v498_v5 = vld [vmem:[#allocation8 + $0xd8] sm:$0xff] }
  0x75   :  { %856 = vmatpush1.bf16.msra.mxu0 %v855_v2  ;;  %882 = vmatpush3.bf16.msra.mxu1 %v881_v3  ;;  %v903_v2 = vpack.c.bf16 %v492_v59, %v489_v56  ;;  %v495_v3 = vld [vmem:[#allocation8 + $0xc0] sm:$0xff]  ;;  %v497_v6 = vld [vmem:[#allocation8 + $0xd0] sm:$0xff]  ;;  %v502_v8 = vld [vmem:[#allocation8 + $0xf8] sm:$0xff] }
  0x76   :  { %858 = vmatprep.subr.bf16.mxu0 %v857_v4  ;;  %883 = vmatprep.subr.bf16.mxu1 %v1119_v0  ;;  %v931_v4 = vpack.c.bf16 %v494_v61, %v491_v60  ;;  %v505_v9 = vld [vmem:[#allocation8 + $0x110] sm:$0xff]  ;;  %v504_v14 = vld [vmem:[#allocation8 + $0x108] sm:$0xff]  ;;  %v503_v15 = vld [vmem:[#allocation8 + $0x100] sm:$0xff] }
  0x77   :  { %v501_v11 = vld [vmem:[#allocation8 + $0xf0] sm:$0xff]  ;;  %v508_v17 = vld [vmem:[#allocation8 + $0x128] sm:$0xff]  ;;  %v511_v18 = vld [vmem:[#allocation8 + $0x140] sm:$0xff] }
  0x78   :  { %v507_v20 = vld [vmem:[#allocation8 + $0x120] sm:$0xff]  ;;  %v517_v27 = vld [vmem:[#allocation8 + $0x170] sm:$0xff]  ;;  %v516_v32 = vld [vmem:[#allocation8 + $0x168] sm:$0xff] }
  0x79   :  { %860 = vmatpush1.bf16.msra.mxu0 %v859_v7  ;;  %885 = vmatpush3.bf16.msra.mxu1 %v884_v10  ;;  %v500_v7 = vld [vmem:[#allocation8 + $0xe8] sm:$0xff]  ;;  %v907_v10 = vpack.c.bf16 %v498_v5, %v495_v3  ;;  %v515_v33 = vld [vmem:[#allocation8 + $0x160] sm:$0xff]  ;;  %v518_v34 = vld [vmem:[#allocation8 + $0x178] sm:$0xff] }
  0x7a   :  { %886 = vmatprep.subr.bf16.mxu1 %v1119_v0  ;;  %862 = vmatprep.subr.bf16.mxu0 %v861_v13  ;;  %v934_v12 = vpack.c.bf16 %v500_v7, %v497_v6  ;;  %v909_v13 = vpack.c.bf16 %v505_v9, %v502_v8  ;;  %v128_v37 = vld [vmem:[%s1288_s2] sm:$0xff]  ;;  %s1122_s2 = smov [#allocation11]  }
  0x7b   :  { %v109_v43 = vld [vmem:[#allocation10 + $0x2] ss:$8 sm:$0x7]  ;;  %v91_v44 = vld [vmem:[#allocation10 + $0x1] ss:$8 sm:$0x7] }
  0x7c   :  { %s688_s20 = sshll.u32 %s1122_s2, 4  ;;  %s689_s20 = int_to_ptr.vmem [resolvable:$true] %s688_s20 }
  0x7d   :  { %864 = vmatpush1.bf16.msra.mxu0 %v863_v16  ;;  %888 = vmatpush3.bf16.msra.mxu1 %v887_v19  ;;  %v506_v16 = vld [vmem:[#allocation8 + $0x118] sm:$0xff]  ;;  %v911_v19 = vpack.c.bf16 %v504_v14, %v501_v11  ;;  %s1082_s21 = scalar_lea.vmem %s689_s20, 128  ;;  %p1087_p13 = scmp.lt.s32.totalorder %s689_s20, %s689_s20 }
  0x7e   :  { %921 = vmatprep.subr.bf16.mxu1 %v1119_v0  ;;  %890 = vmatprep.subr.bf16.mxu0 %v889_v22  ;;  %v937_v21 = vpack.c.bf16 %v506_v16, %v503_v15  ;;  %v913_v22 = vpack.c.bf16 %v511_v18, %v508_v17  ;;  %p1083_p12 = scmp.ne.s32.totalorder %s689_s20, %s1082_s21  ;;  %p1088_p0 = scmp.lt.s32.totalorder %s1082_s21, %s1082_s21 }
  0x80   :  { %p1089_p1 = por %p1088_p0, %p1087_p13 }
  0x82   :  { %p1090_p2 = pnand %p1089_p1, %p1083_p12 }
 0x133   :  { %v203_v23 = vpop.f32.mrb[0].mxu0  ;;  %v276_v25 = vpop.f32.mrb[0].mxu1 }
 0x134   :  { %v749_v26 = vpop.f32.mrb[1].mxu0  ;;  %v277_v28 = vadd.f32 %v276_v25, %v203_v23  ;;  %v756_v29 = vpop.f32.mrb[1].mxu1  ;;  %v510_v23 = vld [vmem:[#allocation8 + $0x138] sm:$0xff]  ;;  %v512_v25 = vld [vmem:[#allocation8 + $0x148] sm:$0xff] }
 0x135   :  { %v514_v26 = vld [vmem:[#allocation8 + $0x158] sm:$0xff]  ;;  %v513_v29 = vld [vmem:[#allocation8 + $0x150] sm:$0xff] }
 0x136   :  { %v280_v35 = vadd.f32 %v277_v28, %v89_v24  ;;  %v509_v24 = vld [vmem:[#allocation8 + $0x130] sm:$0xff]  ;;  %v915_v28 = vpack.c.bf16 %v510_v23, %v507_v20  ;;  %v917_v31 = vpack.c.bf16 %v517_v27, %v514_v26 }
 0x137   :  { %v940_v30 = vpack.c.bf16 %v512_v25, %v509_v24 }
 0x138   :  { %v281_v39 = vmax.f32 %v280_v35, 0.0  ;;  %v919_v35 = vpack.c.bf16 %v516_v32, %v513_v29 }
 0x13a   :  { %395 = vmatmul.mubr.f32.vlgmr.msra.gmra.mrb[2].mxu0 %v281_v39  ;;  %790 = vmatmul.mubr.f32.vlgmr.msra.gmra.mrb[2].mxu1 %v281_v39 }
 0x13b   :  { %892 = vmatpush1.bf16.msra.mxu0 %v891_v36  ;;  %923 = vmatpush3.bf16.msra.mxu1 %v922_v38  ;;  %v943_v36 = vpack.c.bf16 %v518_v34, %v515_v33 }
 0x13c   :  { %894 = vmatprep.subr.bf16.mxu0 %v893_v40  ;;  %924 = vmatprep.subr.bf16.mxu1 %v1119_v0  ;;  %v93_v40 = vlaneseq }
 0x13d   :  { %583 = vmatprep.mubr.f32.mxu0 %v1121_v1  ;;  %824 = vmatprep.mubr.msk.f32.mxu1 %vm1120_vm0, %v1121_v1  ;;  %v905_v1 = vpack.c.bf16 %v499_v63, %v496_v62 }
 0x13e   :  { %v94_v41 = vshrl.u32 %v93_v40, 7 }
 0x13f   :  { %896 = vmatpush1.bf16.msra.mxu0 %v895_v46  ;;  %926 = vmatpush3.bf16.msra.mxu1 %v925_v48 }
 0x140   :  { %898 = vmatprep.subr.bf16.mxu0 %v897_v49  ;;  %927 = vmatprep.subr.bf16.mxu1 %v1119_v0  ;;  %v95_v42 = vsub.s32 0, %v94_v41  ;;  %v99_v45 = vsub.s32 1, %v94_v41  ;;  %v103_v61 = vsub.s32 2, %v94_v41 }
 0x142   :  { %v96_v46 = vrot.slane %v91_v44, %v95_v42  ;;  %v114_v47 = vrot.slane %v109_v43, %v95_v42  ;;  %v100_v48 = vrot.slane %v91_v44, %v99_v45  ;;  %v122_v62 = vrot.slane %v109_v43, %v103_v61 }
 0x143   :  { %900 = vmatpush1.bf16.msra.mxu0 %v899_v55  ;;  %929 = vmatpush3.bf16.msra.mxu1 %v928_v57 }
 0x144   :  { %902 = vmatprep.subr.bf16.mxu0 %v901_v58  ;;  %930 = vmatprep.subr.bf16.mxu1 %v1119_v0  ;;  %v945_v49 = vadd.f32 %v114_v47, %v96_v46 }
 0x147   :  { %904 = vmatpush1.bf16.msra.mxu0 %v903_v2  ;;  %932 = vmatpush3.bf16.msra.mxu1 %v931_v4  ;;  %v104_v2 = vrot.slane %v91_v44, %v103_v61 }
 0x148   :  { %906 = vmatprep.subr.bf16.mxu0 %v905_v1  ;;  %933 = vmatprep.subr.bf16.mxu1 %v1119_v0 }
 0x14b   :  { %908 = vmatpush1.bf16.msra.mxu0 %v907_v10  ;;  %935 = vmatpush3.bf16.msra.mxu1 %v934_v12 }
 0x14c   :  { %910 = vmatprep.subr.bf16.mxu0 %v909_v13  ;;  %936 = vmatprep.subr.bf16.mxu1 %v1119_v0 }
 0x14f   :  { %912 = vmatpush1.bf16.msra.mxu0 %v911_v19  ;;  %938 = vmatpush3.bf16.msra.mxu1 %v937_v21 }
 0x150   :  { %914 = vmatprep.subr.bf16.mxu0 %v913_v22  ;;  %939 = vmatprep.subr.bf16.mxu1 %v1119_v0 }
 0x153   :  { %916 = vmatpush1.bf16.msra.mxu0 %v915_v28  ;;  %941 = vmatpush3.bf16.msra.mxu1 %v940_v30 }
 0x154   :  { %918 = vmatprep.subr.bf16.mxu0 %v917_v31  ;;  %942 = vmatprep.subr.bf16.mxu1 %v1119_v0  ;;  %v118_v0 = vrot.slane %v109_v43, %v99_v45 }
 0x156   :  { %v947_v51 = vadd.f32 %v118_v0, %v100_v48 }
 0x157   :  { %920 = vmatpush1.bf16.msra.mxu0 %v919_v35  ;;  %944 = vmatpush3.bf16.msra.mxu1 %v943_v36 }
 0x15a   :  { %584 = vmatmul.mubr.f32.vlgmr.msra.gmra.mrb[2].mxu0 %v128_v37  ;;  %825 = vmatmul.mubr.f32.vlgmr.msra.gmra.mrb[4].mxu1 %v128_v37 }
 0x20d   :  { %v467_v38 = vpop.f32.mrb[2].mxu1 }
 0x20e   :  { %v791_v39 = vpop.f32.mrb[3].mxu1  ;;  %v468_v5 = vadd.f32 %v467_v38, %v104_v2 }
 0x22d   :  { %v585_v50 = vpop.f32.mrb[2].mxu0  ;;  %v656_v52 = vpop.f32.mrb[4].mxu1 }
 0x22e   :  { %v946_v53 = vadd.f32 %v945_v49, %v585_v50  ;;  %v587_v54 = vpop.f32.mrb[3].mxu0  ;;  %v826_v55 = vpop.f32.mrb[5].mxu1  ;;  %v657_v4 = vadd.f32 %v656_v52, %v122_v62 }
 0x22f   :  { %v948_v57 = vadd.f32 %v947_v51, %v587_v54 }
 0x230   :  { %v701_v56 = vmul.f32 -1.442695, %v946_v53 }
 0x231   :  { %v702_v58 = vmul.f32 -1.442695, %v948_v57 }
 0x232   :  { %962 = vpow2.f32 %v701_v56 }
 0x233   :  { %964 = vpow2.f32 %v702_v58 }
 0x23c   :  { %v963_v59 = vpop.eup %962 }
 0x23d   :  { %v664_v60 = vadd.f32 1.0, %v963_v59  ;;  %v965_v63 = vpop.eup %964 }
 0x23e   :  { %v671_v3 = vadd.f32 1.0, %v965_v63 }
 0x23f   :  { %966 = vrcp.f32 %v664_v60 }
 0x240   :  { %968 = vrcp.f32 %v671_v3 }
 0x249   :  { %v967_v1 = vpop.eup %966 }
 0x24a   :  { %v674_v6 = vmul.f32 %v967_v1, %v657_v4  ;;  %v969_v8 = vpop.eup %968 }
 0x24b   :  { %v677_v9 = vsub.f32 1.0, %v969_v8  ;;  %v679_v12 = vmul.f32 %v969_v8, %v128_v37 }
 0x24c   :  { %v675_v7 = vadd.f32 %v674_v6, %v468_v5 }
 0x24e   :  { %970 = vtanh.f32 %v675_v7 }
 0x258   :  { %v971_v10 = vpop.eup %970 }
 0x259   :  { %v678_v11 = vmul.f32 %v971_v10, %v677_v9 }
 0x25b   :  { %v680_v13 = vadd.f32 %v679_v12, %v678_v11 }
 0x25d   :  { %681 = vst [vmem:[#allocation11] sm:$0xff] %v680_v13 }
 0x25e   :  { %1093 = shalt.err (!%p1090_p2)
}
 0x25f   :  { %s1094_s1 = scalar_lea.hbm %s1293_s7, 128 }
 0x260   :  { %p1095_p3 = scmp.ne.s32.totalorder %s1293_s7, %s1094_s1  ;;  %p1098_p4 = scmp.lt.u32.totalorder %s1094_s1, %s1293_s7 }
 0x262   :  { %p1100_p5 = pnand %p1098_p4, %p1095_p3 }
 0x264   :  { %1103 = shalt.err (!%p1100_p5)
}
 0x265   :  { %691 = dma.vmem_to_hbm [thread:$0]  %s689_s20, 128, %s1293_s7, [#allocation4]  }
 0x266   :  { %1110 = dma.done.wait [#allocation4], 128  }
 0x267   :  { %1111 = vsyncadd [#allocation4], 4294967168 }
 0x268   :  { %695 = vsyncpa [#allocation3], 1 }
 0x269   :  { %696 = vsyncpa [#allocation6], 1 }
 0x26a   :  { %697 = vsyncpa [#allocation9], 1 }
 0x26b   :  { %698 = vsyncpa [#allocation4], 1 }

</bundles_post_ra>
